<compile_context>
chip_gen: v7x
topology: tpu7x:2x2x1
jax: 0.10.0
libtpu: 0.0.40
codegen_flags: <defaults>
</compile_context>

<pallas_src>
import math

import jax
import jax.numpy as jnp
from jax.experimental import pallas as pl
from jax.experimental.pallas import tpu as pltpu


def _round_up(x, m):
    return ((x + m - 1) // m) * m


def _make_aam_kernel(cos_m, sin_m, th, mm, scale, n_classes, tile_n,
                     compute_dtype, normalize_w_in_kernel, with_logits):
    def kernel(x_ref, w_ref, lab_ref, *refs):
        if with_logits:
            logits_ref, per_row_ref, xn_ref, m_ref, l_ref, tgt_ref = refs
        else:
            logits_ref = None
            per_row_ref, xn_ref, m_ref, l_ref, tgt_ref = refs

        j = pl.program_id(1)  # speaker-tile index (reduction axis)

        # Once per batch tile: normalize embeddings into scratch (f32 math,
        # downcast only for the MXU operand), init online-LSE state.
        @pl.when(j == 0)
        def _init():
            x = x_ref[...]                                           # (TB, D) f32
            ss = jnp.sum(x * x, axis=-1, keepdims=True)
            # F.normalize(x, eps=1e-12)  <=>  x * rsqrt(max(||x||^2, 1e-24))
            xn_ref[...] = (x * jax.lax.rsqrt(jnp.maximum(ss, 1e-24))).astype(xn_ref.dtype)
            m_ref[...] = jnp.full_like(m_ref, -jnp.inf)
            l_ref[...] = jnp.zeros_like(l_ref)
            tgt_ref[...] = jnp.zeros_like(tgt_ref)

        w = w_ref[...]                                               # (TN, D)
        if normalize_w_in_kernel:
            wss = jnp.sum(w * w, axis=-1, keepdims=True)
            wn = (w * jax.lax.rsqrt(jnp.maximum(wss, 1e-24))).astype(compute_dtype)
        else:
            wn = w  # pre-normalized (and pre-cast) in the wrapper

        # cosine = xn @ wn.T without a transpose: contract dim 1 with dim 1.
        cosine = jax.lax.dot_general(
            xn_ref[...], wn,
            dimension_numbers=(((1,), (1,)), ((), ())),
            preferred_element_type=jnp.float32)                      # (TB, TN) f32

        # AAM margin math (f32 on the VPU).
        sine = jnp.sqrt(jnp.clip(1.0 - cosine * cosine, 0.0, 1.0))
        phi = cosine * cos_m - sine * sin_m
        phi = jnp.where(cosine - th > 0.0, phi, cosine - mm)

        tb, tn = cosine.shape
        col = jax.lax.broadcasted_iota(jnp.int32, (tb, tn), 1) + j * tile_n
        is_label = col == lab_ref[...]                               # (TB, TN) bool
        output = jnp.where(is_label, phi, cosine) * scale
        if with_logits:
            logits_ref[...] = output.astype(logits_ref.dtype)        # lane-dense store

        # Online logsumexp over the speaker axis; padded columns masked to -inf.
        masked = jnp.where(col < n_classes, output, -jnp.inf)
        m_prev = m_ref[...]
        m_new = jnp.maximum(m_prev, jnp.max(masked, axis=-1, keepdims=True))
        alpha = jnp.exp(m_prev - m_new)
        l_ref[...] = alpha * l_ref[...] + jnp.sum(jnp.exp(masked - m_new),
                                                  axis=-1, keepdims=True)
        m_ref[...] = m_new
        tgt_ref[...] = tgt_ref[...] + jnp.sum(jnp.where(is_label, output, 0.0),
                                              axis=-1, keepdims=True)

        # Finalize per-row cross-entropy on the last speaker tile.
        @pl.when(j == pl.num_programs(1) - 1)
        def _finish():
            per_row_ref[...] = m_ref[...] + jnp.log(l_ref[...]) - tgt_ref[...]

    return kernel


def aamsoftmax_forward(embeddings, weight, labels, margin, scale,
                       tile_n=2048, tile_b=None, batch_splits=None,
                       use_bf16=False, return_logits=True, weight_buffers=2):
    """embeddings: (B, D) f32, weight: (N, D) f32, labels: (B,) int32.

    Matches torch AAMsoftmax.forward: returns {'loss': scalar, 'logits': (B, N)}
    (logits omitted when return_logits=False — loss-only training mode that
    skips the (B, N) HBM writeback).

    use_bf16=True streams W and the logits in bf16 and feeds the MXU with bf16
    operands (biggest relative win on v5e; cosines near the margin decision
    boundary may flip — validate tolerance). Normalization math stays f32.
    """
    B, D = embeddings.shape
    N, D2 = weight.shape
    assert D == D2

    cos_m = math.cos(margin)
    sin_m = math.sin(margin)
    th = math.cos(math.pi - margin)
    mm = math.sin(math.pi - margin) * margin

    # --- batch tiling: cover the whole (padded) batch in one grid step by
    # default (W streamed once). On v7x split the batch across the 2 cores.
    if batch_splits is None:
        batch_splits = 1
        try:
            if "v7" in jax.devices()[0].device_kind.lower():
                batch_splits = 2
        except Exception:
            pass
    b_pad8 = _round_up(B, 8)
    if tile_b is None:
        tile_b = _round_up(-(-b_pad8 // max(1, batch_splits)), 8)
    tile_b = _round_up(max(8, min(tile_b, b_pad8)), 8)

    # --- speaker tiling: lane-dense, large to amortize per-step overhead.
    tile_n = max(128, min(tile_n, _round_up(N, 128)))
    tile_n = _round_up(tile_n, 128)

    w_item = 2 if use_bf16 else 4
    out_item = 2 if use_bf16 else 4
    comp_item = 2 if use_bf16 else 4

    def est_vmem(tb, tn):
        need = 2 * tn * D * w_item                  # streamed weight tiles (x2 buffers)
        need += 2 * tb * D * 4                      # embeddings tile
        if return_logits:
            need += 2 * tb * tn * out_item          # logits tiles (x2 buffers)
        need += tb * D * comp_item                  # normalized-embeddings scratch
        need += 8 * tb * 128 * 4                    # labels / per-row / m / l / tgt (lane-padded)
        return need

    # Generation-aware-safe cap: fits v7x's 32 MiB scoped default with headroom
    # (and trivially fits v5e/v6e's 128 MiB VMEM).
    VMEM_CAP = 24 * 2 ** 20
    while est_vmem(tile_b, tile_n) > VMEM_CAP and tile_n > 128:
        tile_n = max(128, (tile_n // 2) // 128 * 128)
    while est_vmem(tile_b, tile_n) > VMEM_CAP and tile_b > 8:
        tile_b = max(8, (tile_b // 2) // 8 * 8)

    b_pad = _round_up(B, tile_b)
    n_pad = _round_up(N, tile_n)
    num_b = b_pad // tile_b
    num_n = n_pad // tile_n

    compute_dtype = jnp.bfloat16 if use_bf16 else jnp.float32
    out_dtype = jnp.bfloat16 if use_bf16 else jnp.float32

    # Pre-normalize W in the wrapper when it fuses with the bf16 cast (halving
    # the weight stream) or when num_b > 1 would re-normalize every tile num_b
    # times. Default f32 / num_b == 1 case keeps it in-kernel (no extra HBM pass).
    prenorm_w = use_bf16 or num_b > 1
    if prenorm_w:
        wss = jnp.sum(weight * weight, axis=-1, keepdims=True)
        w_in = (weight * jax.lax.rsqrt(jnp.maximum(wss, 1e-24))).astype(compute_dtype)
    else:
        w_in = weight

    x_p = embeddings if b_pad == B else jnp.pad(embeddings, ((0, b_pad - B), (0, 0)))
    w_p = w_in if n_pad == N else jnp.pad(w_in, ((0, n_pad - N), (0, 0)))
    lab2d = labels.astype(jnp.int32).reshape(-1, 1)
    if b_pad != B:
        lab2d = jnp.pad(lab2d, ((0, b_pad - B), (0, 0)))

    kernel = _make_aam_kernel(cos_m, sin_m, th, mm, scale, N, tile_n,
                              compute_dtype, not prenorm_w, return_logits)

    need = est_vmem(tile_b, tile_n)
    vmem_limit = int(min(max(2 * need, 16 * 2 ** 20), 30 * 2 ** 20))

    w_spec_kwargs = {}
    if weight_buffers and weight_buffers > 2:
        # Deepen the weight pipeline only if profiling shows exposed DMA
        # (short MXU time at small D can leave the 2-deep pipeline exposed).
        w_spec_kwargs["pipeline_mode"] = pl.Buffered(weight_buffers)

    in_specs = [
        pl.BlockSpec((tile_b, D), lambda i, j: (i, 0)),                   # embeddings
        pl.BlockSpec((tile_n, D), lambda i, j: (j, 0), **w_spec_kwargs),  # weights (streamed)
        pl.BlockSpec((tile_b, 1), lambda i, j: (i, 0)),                   # labels
    ]
    per_row_spec = pl.BlockSpec((tile_b, 1), lambda i, j: (i, 0))
    if return_logits:
        out_shape = (
            jax.ShapeDtypeStruct((b_pad, n_pad), out_dtype),              # scaled logits
            jax.ShapeDtypeStruct((b_pad, 1), jnp.float32),                # per-row CE loss
        )
        out_specs = (
            pl.BlockSpec((tile_b, tile_n), lambda i, j: (i, j)),
            per_row_spec,
        )
    else:
        out_shape = jax.ShapeDtypeStruct((b_pad, 1), jnp.float32)
        out_specs = per_row_spec

    scratch_shapes = [
        pltpu.VMEM((tile_b, D), compute_dtype),   # normalized embeddings
        pltpu.VMEM((tile_b, 1), jnp.float32),     # running max (m)
        pltpu.VMEM((tile_b, 1), jnp.float32),     # running sum-exp (l)
        pltpu.VMEM((tile_b, 1), jnp.float32),     # label logit
    ]

    result = pl.pallas_call(
        kernel,
        out_shape=out_shape,
        grid_spec=pltpu.PrefetchScalarGridSpec(
            num_scalar_prefetch=0,
            grid=(num_b, num_n),
            in_specs=in_specs,
            out_specs=out_specs,
            scratch_shapes=scratch_shapes,
        ),
        compiler_params=pltpu.CompilerParams(
            dimension_semantics=("parallel", "arbitrary"),
            vmem_limit_bytes=vmem_limit,
        ),
    )(x_p, w_p, lab2d)

    if return_logits:
        logits_p, per_row = result
        logits = logits_p[:B, :N]
    else:
        per_row = result
        logits = None

    loss = jnp.mean(per_row[:B, 0])   # tiny (B,)-mean kept in plain JAX
    out = {"loss": loss}
    if return_logits:
        out["logits"] = logits
    return out


if __name__ == "__main__":
    # Small, deterministic example consistent with the module's forward:
    # embeddings (B, embedding_size), labels (B,) in [0, n_speakers).
    n_speakers = 16
    embedding_size = 192
    batch = 8
    margin = 0.2
    scale = 30.0

    key = jax.random.PRNGKey(0)
    k_emb, k_w, k_lab = jax.random.split(key, 3)

    embeddings = jax.random.normal(k_emb, (batch, embedding_size), dtype=jnp.float32)

    # xavier_normal_(weight, gain=1): std = sqrt(2 / (fan_in + fan_out))
    xavier_std = math.sqrt(2.0 / (n_speakers + embedding_size))
    weight = xavier_std * jax.random.normal(
        k_w, (n_speakers, embedding_size), dtype=jnp.float32)

    labels = jax.random.randint(k_lab, (batch,), 0, n_speakers, dtype=jnp.int32)

    # Default path: f32 streams, full (B, N) logits (matches torch forward).
    out = aamsoftmax_forward(embeddings, weight, labels, margin, scale)
    jax.block_until_ready(out["loss"])
    jax.block_until_ready(out["logits"])

    # Pure-JAX reference of the PyTorch forward.
    xn = embeddings / jnp.maximum(
        jnp.linalg.norm(embeddings, axis=-1, keepdims=True), 1e-12)
    wn = weight / jnp.maximum(jnp.linalg.norm(weight, axis=-1, keepdims=True), 1e-12)
    cosine = xn @ wn.T
    sine = jnp.sqrt(jnp.clip(1.0 - cosine * cosine, 0.0, 1.0))
    phi = cosine * math.cos(margin) - sine * math.sin(margin)
    phi = jnp.where(cosine - math.cos(math.pi - margin) > 0.0,
                    phi, cosine - math.sin(math.pi - margin) * margin)
    one_hot = jax.nn.one_hot(labels, n_speakers, dtype=jnp.float32)
    ref_logits = (one_hot * phi + (1.0 - one_hot) * cosine) * scale
    ref_loss = jnp.mean(
        jax.nn.logsumexp(ref_logits, axis=-1)
        - jnp.take_along_axis(ref_logits, labels[:, None], axis=1)[:, 0])

    assert out["logits"].shape == (batch, n_speakers)
    assert jnp.allclose(out["logits"], ref_logits, atol=1e-4, rtol=1e-4)
    assert jnp.allclose(out["loss"], ref_loss, atol=1e-4, rtol=1e-4)

    # Loss-only mode: skips the (B, N) logits HBM writeback.
    out_lo = aamsoftmax_forward(embeddings, weight, labels, margin, scale,
                                return_logits=False)
    jax.block_until_ready(out_lo["loss"])
    assert jnp.allclose(out_lo["loss"], ref_loss, atol=1e-4, rtol=1e-4)

    # bf16 HBM streams + bf16 MXU operands (throughput path on v5e/v6e/v7x).
    out_bf16 = aamsoftmax_forward(embeddings, weight, labels, margin, scale,
                                  use_bf16=True, return_logits=False)
    jax.block_until_ready(out_bf16["loss"])
    assert bool(jnp.isfinite(out_bf16["loss"]))

    print("KERNEL_OK")
</pallas_src>

<mosaic_0001>
module attributes {stable_mosaic.version = 11 : i64} {
  func.func @kernel(%arg0: i32, %arg1: i32, %arg2: memref<8x192xf32, #tpu.memory_space<vmem>>, %arg3: memref<128x192xf32, #tpu.memory_space<vmem>>, %arg4: memref<8x1xi32, #tpu.memory_space<vmem>>, %arg5: memref<8x128xf32, #tpu.memory_space<vmem>>, %arg6: memref<8x1xf32, #tpu.memory_space<vmem>>, %arg7: memref<8x192xf32, #tpu.memory_space<vmem>>, %arg8: memref<8x1xf32, #tpu.memory_space<vmem>>, %arg9: memref<8x1xf32, #tpu.memory_space<vmem>>, %arg10: memref<8x1xf32, #tpu.memory_space<vmem>>) attributes {dimension_semantics = [#tpu.dimension_semantics<parallel>, #tpu.dimension_semantics<arbitrary>], iteration_bounds = array<i64: 1, 1>, scalar_prefetch = 0 : i64, scratch_operands = 4 : i64, tpu.core_type = #tpu.core_type<tc>, window_params = [{transform_indices = @transform_0, window_bounds = array<i64: 8, 192>}, {transform_indices = @transform_1, window_bounds = array<i64: 128, 192>}, {transform_indices = @transform_2, window_bounds = array<i64: 8, 1>}, {transform_indices = @transform_3, window_bounds = array<i64: 8, 128>}, {transform_indices = @transform_4, window_bounds = array<i64: 8, 1>}]} {
    %c0_i32 = arith.constant 0 : i32
    %0 = arith.cmpi eq, %arg1, %c0_i32 : i32
    %1 = arith.extui %0 : i1 to i32
    %c0_i32_0 = arith.constant 0 : i32
    %2 = arith.cmpi ne, %1, %c0_i32_0 : i32
    scf.if %2 {
      %c0_38 = arith.constant 0 : index
      %c0_39 = arith.constant 0 : index
      %75 = vector.load %arg2[%c0_38, %c0_39] : memref<8x192xf32, #tpu.memory_space<vmem>>, vector<8x192xf32>
      %76 = arith.mulf %75, %75 : vector<8x192xf32>
      %cst_40 = arith.constant dense<0.000000e+00> : vector<8xf32>
      %77 = vector.multi_reduction <add>, %76, %cst_40 [1] : vector<8x192xf32> to vector<8xf32>
      %78 = vector.shape_cast %77 : vector<8xf32> to vector<8x1xf32>
      %cst_41 = arith.constant 1.000000e-24 : f32
      %79 = vector.broadcast %cst_41 : f32 to vector<8x1xf32>
      %80 = arith.maximumf %78, %79 : vector<8x1xf32>
      %81 = math.rsqrt %80 : vector<8x1xf32>
      %82 = vector.broadcast %81 : vector<8x1xf32> to vector<8x192xf32>
      %83 = arith.mulf %75, %82 : vector<8x192xf32>
      %c0_42 = arith.constant 0 : index
      %c0_43 = arith.constant 0 : index
      %84 = vector.load %arg7[%c0_42, %c0_43] : memref<8x192xf32, #tpu.memory_space<vmem>>, vector<8x192xf32>
      tpu.vector_store %arg7[%c0_42, %c0_43], %83 {strides = array<i32>} : memref<8x192xf32, #tpu.memory_space<vmem>>, vector<8x192xf32>,
      %cst_44 = arith.constant 0xFF800000 : f32
      %85 = vector.broadcast %cst_44 : f32 to vector<8x1xf32>
      %c0_45 = arith.constant 0 : index
      %c0_46 = arith.constant 0 : index
      %86 = vector.load %arg8[%c0_45, %c0_46] : memref<8x1xf32, #tpu.memory_space<vmem>>, vector<8x1xf32>
      tpu.vector_store %arg8[%c0_45, %c0_46], %85 {strides = array<i32>} : memref<8x1xf32, #tpu.memory_space<vmem>>, vector<8x1xf32>,
      %cst_47 = arith.constant 0.000000e+00 : f32
      %87 = vector.broadcast %cst_47 : f32 to vector<8x1xf32>
      %c0_48 = arith.constant 0 : index
      %c0_49 = arith.constant 0 : index
      %88 = vector.load %arg9[%c0_48, %c0_49] : memref<8x1xf32, #tpu.memory_space<vmem>>, vector<8x1xf32>
      tpu.vector_store %arg9[%c0_48, %c0_49], %87 {strides = array<i32>} : memref<8x1xf32, #tpu.memory_space<vmem>>, vector<8x1xf32>,
      %cst_50 = arith.constant 0.000000e+00 : f32
      %89 = vector.broadcast %cst_50 : f32 to vector<8x1xf32>
      %c0_51 = arith.constant 0 : index
      %c0_52 = arith.constant 0 : index
      %90 = vector.load %arg10[%c0_51, %c0_52] : memref<8x1xf32, #tpu.memory_space<vmem>>, vector<8x1xf32>
      tpu.vector_store %arg10[%c0_51, %c0_52], %89 {strides = array<i32>} : memref<8x1xf32, #tpu.memory_space<vmem>>, vector<8x1xf32>,
    } else {
    }
    %c0 = arith.constant 0 : index
    %c0_1 = arith.constant 0 : index
    %3 = vector.load %arg3[%c0, %c0_1] : memref<128x192xf32, #tpu.memory_space<vmem>>, vector<128x192xf32>
    %4 = arith.mulf %3, %3 : vector<128x192xf32>
    %cst = arith.constant dense<0.000000e+00> : vector<128xf32>
    %5 = vector.multi_reduction <add>, %4, %cst [1] : vector<128x192xf32> to vector<128xf32>
    %6 = vector.shape_cast %5 : vector<128xf32> to vector<128x1xf32>
    %cst_2 = arith.constant 1.000000e-24 : f32
    %7 = vector.broadcast %cst_2 : f32 to vector<128x1xf32>
    %8 = arith.maximumf %6, %7 : vector<128x1xf32>
    %9 = math.rsqrt %8 : vector<128x1xf32>
    %10 = vector.broadcast %9 : vector<128x1xf32> to vector<128x192xf32>
    %11 = arith.mulf %3, %10 : vector<128x192xf32>
    %c0_3 = arith.constant 0 : index
    %c0_4 = arith.constant 0 : index
    %12 = vector.load %arg7[%c0_3, %c0_4] : memref<8x192xf32, #tpu.memory_space<vmem>>, vector<8x192xf32>
    %cst_5 = arith.constant dense<0.000000e+00> : vector<8x128xf32>
    %13 = tpu.matmul %12, %11, %cst_5 {dimension_numbers = #tpu.dot_dimension_numbers<[1], [1], [0], [0], [0, 0, 1, 0], [], []>} : vector<8x192xf32>, vector<128x192xf32>, vector<8x128xf32> -> vector<8x128xf32>
    %14 = arith.mulf %13, %13 : vector<8x128xf32>
    %cst_6 = arith.constant 1.000000e+00 : f32
    %15 = vector.broadcast %cst_6 : f32 to vector<8x128xf32>
    %16 = arith.subf %15, %14 : vector<8x128xf32>
    %cst_7 = arith.constant 0.000000e+00 : f32
    %cst_8 = arith.constant 1.000000e+00 : f32
    %17 = vector.broadcast %cst_7 : f32 to vector<8x128xf32>
    %18 = arith.maximumf %17, %16 : vector<8x128xf32>
    %19 = vector.broadcast %cst_8 : f32 to vector<8x128xf32>
    %20 = arith.minimumf %19, %18 : vector<8x128xf32>
    %21 = math.sqrt %20 : vector<8x128xf32>
    %cst_9 = arith.constant 0.980066597 : f32
    %22 = vector.broadcast %cst_9 : f32 to vector<8x128xf32>
    %23 = arith.mulf %13, %22 : vector<8x128xf32>
    %cst_10 = arith.constant 0.198669329 : f32
    %24 = vector.broadcast %cst_10 : f32 to vector<8x128xf32>
    %25 = arith.mulf %21, %24 : vector<8x128xf32>
    %26 = arith.subf %23, %25 : vector<8x128xf32>
    %cst_11 = arith.constant -0.980066597 : f32
    %27 = vector.broadcast %cst_11 : f32 to vector<8x128xf32>
    %28 = arith.subf %13, %27 : vector<8x128xf32>
    %cst_12 = arith.constant 0.000000e+00 : f32
    %29 = vector.broadcast %cst_12 : f32 to vector<8x128xf32>
    %30 = arith.cmpf ogt, %28, %29 : vector<8x128xf32>
    %cst_13 = arith.constant 0.0397338644 : f32
    %31 = vector.broadcast %cst_13 : f32 to vector<8x128xf32>
    %32 = arith.subf %13, %31 : vector<8x128xf32>
    %33 = arith.select %30, %26, %32 : vector<8x128xi1>, vector<8x128xf32>
    %34 = tpu.iota {dimensions = array<i32: 1>} : vector<8x128xi32>
    %c128_i32 = arith.constant 128 : i32
    %35 = arith.muli %arg1, %c128_i32 : i32
    %36 = vector.broadcast %35 : i32 to vector<8x128xi32>
    %37 = arith.addi %34, %36 : vector<8x128xi32>
    %c0_14 = arith.constant 0 : index
    %c0_15 = arith.constant 0 : index
    %38 = vector.load %arg4[%c0_14, %c0_15] : memref<8x1xi32, #tpu.memory_space<vmem>>, vector<8x1xi32>
    %39 = vector.broadcast %38 : vector<8x1xi32> to vector<8x128xi32>
    %40 = arith.cmpi eq, %37, %39 : vector<8x128xi32>
    %41 = arith.select %40, %33, %13 : vector<8x128xi1>, vector<8x128xf32>
    %cst_16 = arith.constant 3.000000e+01 : f32
    %42 = vector.broadcast %cst_16 : f32 to vector<8x128xf32>
    %43 = arith.mulf %41, %42 : vector<8x128xf32>
    %c0_17 = arith.constant 0 : index
    %c0_18 = arith.constant 0 : index
    %44 = vector.load %arg5[%c0_17, %c0_18] : memref<8x128xf32, #tpu.memory_space<vmem>>, vector<8x128xf32>
    tpu.vector_store %arg5[%c0_17, %c0_18], %43 {strides = array<i32>} : memref<8x128xf32, #tpu.memory_space<vmem>>, vector<8x128xf32>,
    %c16_i32 = arith.constant 16 : i32
    %45 = vector.broadcast %c16_i32 : i32 to vector<8x128xi32>
    %46 = arith.cmpi slt, %37, %45 : vector<8x128xi32>
    %cst_19 = arith.constant 0xFF800000 : f32
    %47 = vector.broadcast %cst_19 : f32 to vector<8x128xf32>
    %48 = arith.select %46, %43, %47 : vector<8x128xi1>, vector<8x128xf32>
    %c0_20 = arith.constant 0 : index
    %c0_21 = arith.constant 0 : index
    %49 = vector.load %arg8[%c0_20, %c0_21] : memref<8x1xf32, #tpu.memory_space<vmem>>, vector<8x1xf32>
    %cst_22 = arith.constant dense<0xFF800000> : vector<8xf32>
    %50 = vector.multi_reduction <maximumf>, %48, %cst_22 [1] : vector<8x128xf32> to vector<8xf32>
    %51 = vector.shape_cast %50 : vector<8xf32> to vector<8x1xf32>
    %52 = arith.maximumf %49, %51 : vector<8x1xf32>
    %53 = arith.subf %49, %52 : vector<8x1xf32>
    %54 = math.exp %53 : vector<8x1xf32>
    %c0_23 = arith.constant 0 : index
    %c0_24 = arith.constant 0 : index
    %55 = vector.load %arg9[%c0_23, %c0_24] : memref<8x1xf32, #tpu.memory_space<vmem>>, vector<8x1xf32>
    %56 = arith.mulf %54, %55 : vector<8x1xf32>
    %57 = vector.broadcast %52 : vector<8x1xf32> to vector<8x128xf32>
    %58 = arith.subf %48, %57 : vector<8x128xf32>
    %59 = math.exp %58 : vector<8x128xf32>
    %cst_25 = arith.constant dense<0.000000e+00> : vector<8xf32>
    %60 = vector.multi_reduction <add>, %59, %cst_25 [1] : vector<8x128xf32> to vector<8xf32>
    %61 = vector.shape_cast %60 : vector<8xf32> to vector<8x1xf32>
    %62 = arith.addf %56, %61 : vector<8x1xf32>
    %c0_26 = arith.constant 0 : index
    %c0_27 = arith.constant 0 : index
    %63 = vector.load %arg9[%c0_26, %c0_27] : memref<8x1xf32, #tpu.memory_space<vmem>>, vector<8x1xf32>
    tpu.vector_store %arg9[%c0_26, %c0_27], %62 {strides = array<i32>} : memref<8x1xf32, #tpu.memory_space<vmem>>, vector<8x1xf32>,
    %c0_28 = arith.constant 0 : index
    %c0_29 = arith.constant 0 : index
    %64 = vector.load %arg8[%c0_28, %c0_29] : memref<8x1xf32, #tpu.memory_space<vmem>>, vector<8x1xf32>
    tpu.vector_store %arg8[%c0_28, %c0_29], %52 {strides = array<i32>} : memref<8x1xf32, #tpu.memory_space<vmem>>, vector<8x1xf32>,
    %c0_30 = arith.constant 0 : index
    %c0_31 = arith.constant 0 : index
    %65 = vector.load %arg10[%c0_30, %c0_31] : memref<8x1xf32, #tpu.memory_space<vmem>>, vector<8x1xf32>
    %cst_32 = arith.constant 0.000000e+00 : f32
    %66 = vector.broadcast %cst_32 : f32 to vector<8x128xf32>
    %67 = arith.select %40, %43, %66 : vector<8x128xi1>, vector<8x128xf32>
    %cst_33 = arith.constant dense<0.000000e+00> : vector<8xf32>
    %68 = vector.multi_reduction <add>, %67, %cst_33 [1] : vector<8x128xf32> to vector<8xf32>
    %69 = vector.shape_cast %68 : vector<8xf32> to vector<8x1xf32>
    %70 = arith.addf %65, %69 : vector<8x1xf32>
    %c0_34 = arith.constant 0 : index
    %c0_35 = arith.constant 0 : index
    %71 = vector.load %arg10[%c0_34, %c0_35] : memref<8x1xf32, #tpu.memory_space<vmem>>, vector<8x1xf32>
    tpu.vector_store %arg10[%c0_34, %c0_35], %70 {strides = array<i32>} : memref<8x1xf32, #tpu.memory_space<vmem>>, vector<8x1xf32>,
    %c0_i32_36 = arith.constant 0 : i32
    %72 = arith.cmpi eq, %arg1, %c0_i32_36 : i32
    %73 = arith.extui %72 : i1 to i32
    %c0_i32_37 = arith.constant 0 : i32
    %74 = arith.cmpi ne, %73, %c0_i32_37 : i32
    scf.if %74 {
      %c0_38 = arith.constant 0 : index
      %c0_39 = arith.constant 0 : index
      %75 = vector.load %arg8[%c0_38, %c0_39] : memref<8x1xf32, #tpu.memory_space<vmem>>, vector<8x1xf32>
      %c0_40 = arith.constant 0 : index
      %c0_41 = arith.constant 0 : index
      %76 = vector.load %arg9[%c0_40, %c0_41] : memref<8x1xf32, #tpu.memory_space<vmem>>, vector<8x1xf32>
      %77 = math.log %76 : vector<8x1xf32>
      %78 = arith.addf %75, %77 : vector<8x1xf32>
      %c0_42 = arith.constant 0 : index
      %c0_43 = arith.constant 0 : index
      %79 = vector.load %arg10[%c0_42, %c0_43] : memref<8x1xf32, #tpu.memory_space<vmem>>, vector<8x1xf32>
      %80 = arith.subf %78, %79 : vector<8x1xf32>
      %c0_44 = arith.constant 0 : index
      %c0_45 = arith.constant 0 : index
      %81 = vector.load %arg6[%c0_44, %c0_45] : memref<8x1xf32, #tpu.memory_space<vmem>>, vector<8x1xf32>
      tpu.vector_store %arg6[%c0_44, %c0_45], %80 {strides = array<i32>} : memref<8x1xf32, #tpu.memory_space<vmem>>, vector<8x1xf32>,
    } else {
    }
    return
  }
  func.func @transform_0(%arg0: i32, %arg1: i32) -> (i32, i32) {
    %c0_i32 = arith.constant 0 : i32
    %c0_i32_0 = arith.constant 0 : i32
    return %arg0, %c0_i32 : i32, i32
  }
  func.func @transform_1(%arg0: i32, %arg1: i32) -> (i32, i32) {
    %c0_i32 = arith.constant 0 : i32
    %c0_i32_0 = arith.constant 0 : i32
    return %arg1, %c0_i32 : i32, i32
  }
  func.func @transform_2(%arg0: i32, %arg1: i32) -> (i32, i32) {
    %c0_i32 = arith.constant 0 : i32
    %c0_i32_0 = arith.constant 0 : i32
    return %arg0, %c0_i32 : i32, i32
  }
  func.func @transform_3(%arg0: i32, %arg1: i32) -> (i32, i32) {
    %c0_i32 = arith.constant 0 : i32
    return %arg0, %arg1 : i32, i32
  }
  func.func @transform_4(%arg0: i32, %arg1: i32) -> (i32, i32) {
    %c0_i32 = arith.constant 0 : i32
    %c0_i32_0 = arith.constant 0 : i32
    return %arg0, %c0_i32 : i32, i32
  }
}

</mosaic_0001>

<bundles_post_ra>
// kernel: tpu_custom_call.1
= control target key start
LH: loop header
LB: loop body
LE: loop exit
PB: predicated region body
PF: predicated region fallthrough
CT: control target
= control target key end

     0   :  { %vm25_vm0 = vcmask 523264   ;;  %s945_s0 = inlined_call_operand.vmem [shape: f32[8,192], index: 0, kind: input, shape index: {}]   ;;  %s946_s1 = inlined_call_operand.vmem [shape: f32[128,192], index: 1, kind: input, shape index: {}]   ;;  %s947_s2 = inlined_call_operand.vmem [shape: s32[8,1], index: 2, kind: input, shape index: {}]   ;;  %s948_s3 = inlined_call_operand.hbm [shape: f32[8,128], index: 3, kind: output, shape index: {0}]   ;;  %s949_s4 = inlined_call_operand.vmem [shape: f32[8,1], index: 4, kind: output, shape index: {1}]  }
   0x1   :  { %v610_v0 = vld [vmem:[%s946_s1] sm:$0xff]  ;;  %v615_v1 = vld [vmem:[%s946_s1 + $0x8] sm:$0xff]  ;;  %v636_v7 = vld [vmem:[%s946_s1 + $0x10] sm:$0xff] }
   0x2   :  { %v620_v2 = vld [vmem:[%s946_s1 + $0x20] sm:$0xff]  ;;  %v72_v3 = vmul.f32 %v610_v0, %v610_v0  ;;  %v73_v4 = vmul.f32 %v615_v1, %v615_v1  ;;  %v629_v5 = vld [vmem:[%s946_s1 + $0x28] sm:$0xff]  ;;  %v641_v8 = vld [vmem:[%s946_s1 + $0x18] sm:$0xff]  ;;  %v74_v10 = vmul.f32 %v636_v7, %v636_v7 }
   0x3   :  { %v76_v6 = vmul.f32 %v620_v2, %v620_v2  ;;  %v77_v9 = vmul.f32 %v629_v5, %v629_v5  ;;  %v75_v11 = vmul.f32 %v641_v8, %v641_v8  ;;  %v652_v12 = vld [vmem:[%s946_s1 + $0x30] sm:$0xff]  ;;  %v657_v13 = vld [vmem:[%s946_s1 + $0x38] sm:$0xff]  ;;  %v672_v18 = vld [vmem:[%s946_s1 + $0x40] sm:$0xff] }
   0x4   :  { %v105_v14 = vsel %vm25_vm0, %v73_v4, 0.0  ;;  %v78_v15 = vmul.f32 %v652_v12, %v652_v12  ;;  %v79_v16 = vmul.f32 %v657_v13, %v657_v13  ;;  %v667_v17 = vld [vmem:[%s946_s1 + $0x58] sm:$0xff]  ;;  %v677_v19 = vld [vmem:[%s946_s1 + $0x48] sm:$0xff]  ;;  %v684_v23 = vld [vmem:[%s946_s1 + $0x50] sm:$0xff]  ;;  %v80_v30 = vmul.f32 %v672_v18, %v672_v18 }
   0x5   :  { %v106_v20 = vadd.f32 %v105_v14, %v72_v3  ;;  %v113_v21 = vsel %vm25_vm0, %v77_v9, 0.0  ;;  %v109_v22 = vsel %vm25_vm0, %v75_v11, 0.0  ;;  %v83_v24 = vmul.f32 %v667_v17, %v667_v17  ;;  %v692_v27 = vld [vmem:[%s946_s1 + $0x78] sm:$0xff]  ;;  %v697_v28 = vld [vmem:[%s946_s1 + $0x68] sm:$0xff]  ;;  %v708_v34 = vld [vmem:[%s946_s1 + $0x60] sm:$0xff] }
   0x6   :  { %v114_v25 = vadd.f32 %v113_v21, %v76_v6  ;;  %v117_v26 = vsel %vm25_vm0, %v79_v16, 0.0  ;;  %v110_v29 = vadd.f32 %v109_v22, %v74_v10  ;;  %v81_v31 = vmul.f32 %v677_v19, %v677_v19  ;;  %v717_v38 = vld [vmem:[%s946_s1 + $0x70] sm:$0xff]  ;;  %v724_v40 = vld [vmem:[%s946_s1 + $0x88] sm:$0xff]  ;;  %v729_v41 = vld [vmem:[%s946_s1 + $0x98] sm:$0xff] }
   0x7   :  { %107 = vadd.xlane.f32.xlu0 %v106_v20  ;;  %v118_v32 = vadd.f32 %v117_v26, %v78_v15  ;;  %v82_v33 = vmul.f32 %v684_v23, %v684_v23  ;;  %v85_v35 = vmul.f32 %v697_v28, %v697_v28  ;;  %v125_v36 = vsel %vm25_vm0, %v83_v24, 0.0  ;;  %v739_v47 = vld [vmem:[%s946_s1 + $0x80] sm:$0xff] }
   0x8   :  { %115 = vadd.xlane.f32.xlu1 %v114_v25  ;;  %v121_v37 = vsel %vm25_vm0, %v81_v31, 0.0  ;;  %v87_v39 = vmul.f32 %v692_v27, %v692_v27  ;;  %v84_v43 = vmul.f32 %v708_v34, %v708_v34  ;;  %v86_v45 = vmul.f32 %v717_v38, %v717_v38 }
   0x9   :  { %v122_v42 = vadd.f32 %v121_v37, %v80_v30  ;;  %v126_v44 = vadd.f32 %v125_v36, %v82_v33  ;;  %v129_v46 = vsel %vm25_vm0, %v85_v35, 0.0  ;;  %v89_v48 = vmul.f32 %v724_v40, %v724_v40 }
   0xb   :  { %111 = vadd.xlane.f32.xlu0 %v110_v29 }
   0xc   :  { %119 = vadd.xlane.f32.xlu1 %v118_v32 }
   0xd   :  { %10 = vsyncpa [#allocation7], 0  ;;  %v133_v49 = vsel %vm25_vm0, %v87_v39, 0.0  ;;  %v747_v50 = vld [vmem:[%s946_s1 + $0x90] sm:$0xff]  ;;  %v91_v51 = vmul.f32 %v729_v41, %v729_v41  ;;  %v754_v52 = vld [vmem:[%s946_s1 + $0xa8] sm:$0xff]  ;;  %v130_v54 = vadd.f32 %v129_v46, %v84_v43  ;;  %v88_v55 = vmul.f32 %v739_v47, %v739_v47 }
   0xe   :  { %v759_v53 = vld [vmem:[%s946_s1 + $0xb8] sm:$0xff]  ;;  %v134_v56 = vadd.f32 %v133_v49, %v86_v45  ;;  %v90_v57 = vmul.f32 %v747_v50, %v747_v50  ;;  %v137_v58 = vsel %vm25_vm0, %v89_v48, 0.0  ;;  %v769_v59 = vld [vmem:[%s946_s1 + $0xa0] sm:$0xff]  ;;  %v93_v60 = vmul.f32 %v754_v52, %v754_v52  ;;  %v777_v62 = vld [vmem:[%s946_s1 + $0xb0] sm:$0xff] }
   0xf   :  { %123 = vadd.xlane.f32.xlu0 %v122_v42  ;;  %v141_v61 = vsel %vm25_vm0, %v91_v51, 0.0  ;;  %v95_v63 = vmul.f32 %v759_v53, %v759_v53  ;;  %v784_v3 = vld [vmem:[%s946_s1 + $0xc8] sm:$0xff]  ;;  %v789_v4 = vld [vmem:[%s946_s1 + $0xd8] sm:$0xff]  ;;  %v138_v6 = vadd.f32 %v137_v58, %v88_v55  ;;  %v92_v9 = vmul.f32 %v769_v59, %v769_v59  ;;  %v799_v15 = vld [vmem:[%s946_s1 + $0xc0] sm:$0xff] }
  0x10   :  { %127 = vadd.xlane.f32.xlu1 %v126_v44  ;;  %v142_v10 = vadd.f32 %v141_v61, %v90_v57  ;;  %v94_v11 = vmul.f32 %v777_v62, %v777_v62  ;;  %v145_v14 = vsel %vm25_vm0, %v93_v60, 0.0  ;;  %v97_v16 = vmul.f32 %v784_v3, %v784_v3  ;;  %v807_v21 = vld [vmem:[%s946_s1 + $0xd0] sm:$0xff]  ;;  %v814_v24 = vld [vmem:[%s946_s1 + $0xe8] sm:$0xff]  ;;  %v819_v25 = vld [vmem:[%s946_s1 + $0xf8] sm:$0xff] }
  0x11   :  { %v149_v20 = vsel %vm25_vm0, %v95_v63, 0.0  ;;  %v99_v22 = vmul.f32 %v789_v4, %v789_v4  ;;  %v146_v26 = vadd.f32 %v145_v14, %v92_v9  ;;  %v96_v29 = vmul.f32 %v799_v15, %v799_v15  ;;  %v829_v33 = vld [vmem:[%s946_s1 + $0xe0] sm:$0xff]  ;;  %v837_v37 = vld [vmem:[%s946_s1 + $0xf0] sm:$0xff]  ;;  %v844_v42 = vld [vmem:[%s945_s0 + $0x8] sm:$0xff] }
  0x12   :  { %v150_v30 = vadd.f32 %v149_v20, %v94_v11  ;;  %v98_v31 = vmul.f32 %v807_v21, %v807_v21  ;;  %v153_v32 = vsel %vm25_vm0, %v97_v16, 0.0  ;;  %v101_v35 = vmul.f32 %v814_v24, %v814_v24  ;;  %v854_v49 = vld [vmem:[%s945_s0] sm:$0xff]  ;;  %vm872_vm1 = vmpackc.low %vm25_vm0, %vm25_vm0 }
  0x13   :  { %131 = vadd.xlane.f32.xlu0 %v130_v54  ;;  %v157_v36 = vsel %vm25_vm0, %v99_v22, 0.0  ;;  %v103_v39 = vmul.f32 %v819_v25, %v819_v25  ;;  %v154_v43 = vadd.f32 %v153_v32, %v96_v29  ;;  %v100_v44 = vmul.f32 %v829_v33, %v829_v33  ;;  %v379_v61 = vld [vmem:[%s947_s2] sm:$0xff]  ;;  %s581_s2 = smov [#allocation6]  }
  0x14   :  { %135 = vadd.xlane.f32.xlu1 %v134_v56  ;;  %v158_v45 = vadd.f32 %v157_v36, %v98_v31  ;;  %v102_v46 = vmul.f32 %v837_v37, %v837_v37  ;;  %v161_v48 = vsel %vm25_vm0, %v101_v35, 0.0  ;;  %v24_v51 = vmul.f32 %v844_v42, %v844_v42  ;;  %s435_s5 = sshll.u32 %s581_s2, 4  ;;  %s436_s5 = int_to_ptr.vmem [resolvable:$true] %s435_s5 }
  0x15   :  { %v165_v54 = vsel %vm25_vm0, %v103_v39, 0.0  ;;  %v162_v55 = vadd.f32 %v161_v48, %v100_v44  ;;  %v23_v56 = vmul.f32 %v854_v49, %v854_v49  ;;  %v578_v63 = vmov 0   ;;  %s554_s6 = scalar_lea.vmem %s436_s5, 128  ;;  %p559_p1 = scmp.lt.s32.totalorder %s436_s5, %s436_s5 }
  0x16   :  { %v166_v57 = vadd.f32 %v165_v54, %v102_v46  ;;  %v26_v58 = vsel %vm25_vm0, %v24_v51, 0.0  ;;  %510 = vset.pattern.permute.xlu1 %v578_v63  ;;  %511 = vset.pattern.permute.xlu0 %v578_v63  ;;  %vm36_vm2 = vcmask 7168   ;;  %p555_p0 = scmp.ne.s32.totalorder %s436_s5, %s554_s6  ;;  %p560_p2 = scmp.lt.s32.totalorder %s554_s6, %s554_s6 }
  0x17   :  { %139 = vadd.xlane.f32.xlu0 %v138_v6  ;;  %v27_v60 = vadd.f32 %v26_v58, %v23_v56  ;;  %v374_v58 = vlaneseq }
  0x18   :  { %143 = vadd.xlane.f32.xlu1 %v142_v10  ;;  %p561_p3 = por %p560_p2, %p559_p1 }
  0x1a   :  { %p562_p4 = pnand %p561_p3, %p555_p0 }
  0x1b   :  { %147 = vadd.xlane.f32.xlu0 %v146_v26 }
  0x1c   :  { %151 = vadd.xlane.f32.xlu1 %v150_v30 }
  0x1f   :  { %155 = vadd.xlane.f32.xlu0 %v154_v43 }
  0x20   :  { %159 = vadd.xlane.f32.xlu1 %v158_v45 }
  0x23   :  { %163 = vadd.xlane.f32.xlu0 %v162_v55 }
  0x24   :  { %167 = vadd.xlane.f32.xlu1 %v166_v57 }
  0x27   :  { %28 = vadd.xlane.f32.xlu0 %v27_v60 }
  0x35   :  { %381 = vperm.xlu1 %510, %v379_v61  }
  0x94   :  { %v108_v6 = vpop.xlane.xlu0 %107 }
  0x95   :  { %v169_v9 = vmax.f32 %v108_v6, 1e-24  ;;  %v116_v10 = vpop.xlane.xlu1 %115 }
  0x96   :  { %v171_v11 = vmax.f32 %v116_v10, 1e-24 }
  0x97   :  { %512 = vrsqrt.f32 %v169_v9 }
  0x98   :  { %514 = vrsqrt.f32 %v171_v11  ;;  %v112_v14 = vpop.xlane.xlu0 %111 }
  0x99   :  { %v170_v16 = vmax.f32 %v112_v14, 1e-24  ;;  %v120_v20 = vpop.xlane.xlu1 %119 }
  0x9a   :  { %v172_v22 = vmax.f32 %v120_v20, 1e-24 }
  0x9b   :  { %516 = vrsqrt.f32 %v170_v16 }
  0x9c   :  { %518 = vrsqrt.f32 %v172_v22  ;;  %v124_v26 = vpop.xlane.xlu0 %123 }
  0x9d   :  { %v128_v29 = vpop.xlane.xlu1 %127  ;;  %v173_v30 = vmax.f32 %v124_v26, 1e-24 }
  0x9e   :  { %v174_v31 = vmax.f32 %v128_v29, 1e-24 }
  0x9f   :  { %520 = vrsqrt.f32 %v173_v30 }
  0xa0   :  { %522 = vrsqrt.f32 %v174_v31  ;;  %v132_v32 = vpop.xlane.xlu0 %131 }
  0xa1   :  { %v513_v35 = vpop.eup %512  ;;  %v136_v36 = vpop.xlane.xlu1 %135  ;;  %v175_v43 = vmax.f32 %v132_v32, 1e-24 }
  0xa2   :  { %v515_v39 = vpop.eup %514  ;;  %v176_v44 = vmax.f32 %v136_v36, 1e-24  ;;  %v202_v48 = vmul.f32 %v513_v35, %v615_v1  ;;  %v201_v56 = vmul.f32 %v513_v35, %v610_v0 }
  0xa3   :  { %v206_v51 = vmul.f32 %v515_v39, %v629_v5  ;;  %524 = vrsqrt.f32 %v175_v43  ;;  %v205_v14 = vmul.f32 %v515_v39, %v620_v2 }
  0xa4   :  { %v140_v45 = vpop.xlane.xlu0 %139  ;;  %526 = vrsqrt.f32 %v176_v44 }
  0xa5   :  { %v517_v46 = vpop.eup %516  ;;  %v144_v5 = vpop.xlane.xlu1 %143  ;;  %v177_v0 = vmax.f32 %v140_v45, 1e-24 }
  0xa6   :  { %v519_v54 = vpop.eup %518  ;;  %v204_v55 = vmul.f32 %v517_v46, %v641_v8  ;;  %v203_v57 = vmul.f32 %v517_v46, %v636_v7  ;;  %v178_v7 = vmax.f32 %v144_v5, 1e-24 }
  0xa7   :  { %v208_v60 = vmul.f32 %v519_v54, %v657_v13  ;;  %v207_v16 = vmul.f32 %v519_v54, %v652_v12  ;;  %528 = vrsqrt.f32 %v177_v0 }
  0xa8   :  { %v466_v1 = vpack.c.bf16 %v204_v55, %v202_v48  ;;  %v469_v61 = vpack.c.bf16 %v203_v57, %v201_v56  ;;  %v148_v63 = vpop.xlane.xlu0 %147  ;;  %530 = vrsqrt.f32 %v178_v7 }
  0xa9   :  { %v521_v6 = vpop.eup %520  ;;  %v471_v8 = vpack.c.bf16 %v208_v60, %v206_v51  ;;  %v152_v20 = vpop.xlane.xlu1 %151  ;;  %v474_v31 = vpack.c.bf16 %v207_v16, %v205_v14  ;;  %v179_v32 = vmax.f32 %v148_v63, 1e-24 }
  0xaa   :  { %v523_v9 = vpop.eup %522  ;;  %468 = vmatprep.subr.msk.bf16.mxu0 %vm872_vm1, %v466_v1  ;;  %v210_v10 = vmul.f32 %v521_v6, %v677_v19  ;;  %v180_v35 = vmax.f32 %v152_v20, 1e-24  ;;  %v209_v19 = vmul.f32 %v521_v6, %v672_v18 }
  0xab   :  { %470 = vmatpush1.bf16.xpose.msra.mxu0 %v469_v61  ;;  %v212_v13 = vmul.f32 %v523_v9, %v667_v17  ;;  %v211_v17 = vmul.f32 %v523_v9, %v684_v23  ;;  %532 = vrsqrt.f32 %v179_v32 }
  0xac   :  { %473 = vmatprep.subr.msk.bf16.mxu0 %vm872_vm1, %v471_v8  ;;  %v156_v11 = vpop.xlane.xlu0 %155  ;;  %534 = vrsqrt.f32 %v180_v35 }
  0xad   :  { %v525_v22 = vpop.eup %524  ;;  %v476_v26 = vpack.c.bf16 %v212_v13, %v210_v10  ;;  %v479_v43 = vpack.c.bf16 %v211_v17, %v209_v19  ;;  %v160_v46 = vpop.xlane.xlu1 %159  ;;  %v181_v18 = vmax.f32 %v156_v11, 1e-24 }
  0xae   :  { %v527_v30 = vpop.eup %526  ;;  %v214_v2 = vmul.f32 %v525_v22, %v697_v28  ;;  %v213_v23 = vmul.f32 %v525_v22, %v708_v34  ;;  %v182_v54 = vmax.f32 %v160_v46, 1e-24 }
  0xaf   :  { %v216_v12 = vmul.f32 %v527_v30, %v692_v27  ;;  %v215_v51 = vmul.f32 %v527_v30, %v717_v38 }
  0xb0   :  { %v164_v29 = vpop.xlane.xlu0 %163 }
  0xb1   :  { %v529_v44 = vpop.eup %528  ;;  %v481_v45 = vpack.c.bf16 %v216_v12, %v214_v2  ;;  %v484_v56 = vpack.c.bf16 %v215_v51, %v213_v23  ;;  %v168_v1 = vpop.xlane.xlu1 %167  ;;  %v183_v5 = vmax.f32 %v164_v29, 1e-24 }
  0xb2   :  { %v531_v48 = vpop.eup %530  ;;  %v218_v27 = vmul.f32 %v529_v44, %v724_v40  ;;  %v217_v63 = vmul.f32 %v529_v44, %v739_v47  ;;  %v184_v6 = vmax.f32 %v168_v1, 1e-24 }
  0xb3   :  { %475 = vmatpush1.bf16.xpose.msra.mxu0 %v474_v31  ;;  %v220_v28 = vmul.f32 %v531_v48, %v729_v41  ;;  %v219_v40 = vmul.f32 %v531_v48, %v747_v50 }
  0xb4   :  { %478 = vmatprep.subr.msk.bf16.mxu0 %vm872_vm1, %v476_v26  ;;  %v29_v36 = vpop.xlane.xlu0 %28 }
  0xb5   :  { %v30_v39 = vmax.f32 %v29_v36, 1e-24  ;;  %v533_v55 = vpop.eup %532  ;;  %v486_v60 = vpack.c.bf16 %v220_v28, %v218_v27  ;;  %v489_v9 = vpack.c.bf16 %v219_v40, %v217_v63  ;;  %v382_v2 = vpop.permute.xlu1 %381 }
  0xb6   :  { %v535_v57 = vpop.eup %534  ;;  %v222_v41 = vmul.f32 %v533_v55, %v754_v52  ;;  %v221_v47 = vmul.f32 %v533_v55, %v769_v59 }
  0xb7   :  { %536 = vrsqrt.f32 %v30_v39  ;;  %v224_v8 = vmul.f32 %v535_v57, %v759_v53  ;;  %v223_v50 = vmul.f32 %v535_v57, %v777_v62 }
  0xb8   :  { %538 = vrsqrt.f32 %v181_v18 }
  0xb9   :  { %540 = vrsqrt.f32 %v182_v54  ;;  %v494_v53 = vpack.c.bf16 %v223_v50, %v221_v47  ;;  %v580_v54 = vmov 0.0  }
  0xba   :  { %542 = vrsqrt.f32 %v183_v5  ;;  %39 = vst.msk [vmem:[#allocation5] sm:$0xff] %vm36_vm2, %v580_v54  ;;  %38 = vst.msk [vmem:[#allocation4] sm:$0xff] %vm36_vm2, %v580_v54 }
  0xbb   :  { %480 = vmatpush1.bf16.xpose.msra.mxu0 %v479_v43  ;;  %544 = vrsqrt.f32 %v184_v6 }
  0xbc   :  { %483 = vmatprep.subr.msk.bf16.mxu0 %vm872_vm1, %v481_v45 }
  0xc1   :  { %v537_v61 = vpop.eup %536  ;;  %v412_v5 = vld [vmem:[#allocation5] sm:$0xff] }
  0xc2   :  { %v32_v34 = vmul.f32 %v537_v61, %v854_v49  ;;  %v33_v38 = vmul.f32 %v537_v61, %v844_v42  ;;  %v539_v49 = vpop.eup %538  ;;  %v491_v42 = vpack.c.bf16 %v224_v8, %v222_v41 }
  0xc3   :  { %485 = vmatpush1.bf16.xpose.msra.mxu0 %v484_v56  ;;  %v541_v0 = vpop.eup %540  ;;  %v226_v10 = vmul.f32 %v539_v49, %v784_v3  ;;  %v225_v16 = vmul.f32 %v539_v49, %v799_v15 }
  0xc4   :  { %488 = vmatprep.subr.msk.bf16.mxu0 %vm872_vm1, %v486_v60  ;;  %35 = vst.msk [vmem:[#allocation2 + $0x8] sm:$0xff] %vm25_vm0, %v33_v38  ;;  %v228_v52 = vmul.f32 %v541_v0, %v789_v4  ;;  %v543_v13 = vpop.eup %542  ;;  %v227_v59 = vmul.f32 %v541_v0, %v807_v21  ;;  %v579_v21 = vmov -inf  }
  0xc5   :  { %v545_v14 = vpop.eup %544  ;;  %v230_v62 = vmul.f32 %v543_v13, %v814_v24  ;;  %v229_v22 = vmul.f32 %v543_v13, %v829_v33  ;;  %37 = vst.msk [vmem:[#allocation3] sm:$0xff] %vm36_vm2, %v579_v21 }
  0xc6   :  { %v496_v11 = vpack.c.bf16 %v228_v52, %v226_v10  ;;  %v232_v3 = vmul.f32 %v545_v14, %v819_v25  ;;  %v499_v20 = vpack.c.bf16 %v227_v59, %v225_v16  ;;  %v231_v26 = vmul.f32 %v545_v14, %v837_v37 }
  0xc7   :  { %v375_v37 = vand.u32 127, %v374_v58 }
  0xc8   :  { %v501_v4 = vpack.c.bf16 %v232_v3, %v230_v62  ;;  %v504_v15 = vpack.c.bf16 %v231_v26, %v229_v22 }
  0xc9   :  { %vm383_vm5 = vcmp.eq.s32.totalorder %v375_v37, %v382_v2  ;;  %vm387_vm7 = vcmp.lt.s32.totalorder %v375_v37, 16 }
  0xcb   :  { %490 = vmatpush1.bf16.xpose.msra.mxu0 %v489_v9  ;;  %v234_v7 = vld [vmem:[#allocation2 + $0x8] sm:$0xff] }
  0xcc   :  { %493 = vmatprep.subr.msk.bf16.mxu0 %vm872_vm1, %v491_v42  ;;  %463 = vmatprep.mubr.msk.f32.mxu0 %vm25_vm0, %v234_v7  ;;  %v389_v27 = vld [vmem:[#allocation3] sm:$0xff] }
  0xd3   :  { %495 = vmatpush1.bf16.xpose.msra.mxu0 %v494_v53 }
  0xd4   :  { %498 = vmatprep.subr.msk.bf16.mxu0 %vm872_vm1, %v496_v11 }
  0xdb   :  { %500 = vmatpush1.bf16.xpose.msra.mxu0 %v499_v20 }
  0xdc   :  { %503 = vmatprep.subr.msk.bf16.mxu0 %vm872_vm1, %v501_v4 }
  0xe3   :  { %505 = vmatpush1.bf16.xpose.msra.mxu0 %v504_v15 }
  0xea   :  { %351 = vmatmul.mubr.f32.vlgmr.msra.gmra.mrb[0].mxu0 %v32_v34 }
 0x1bd   :  { %v352_v24 = vpop.f32.mrb[0].mxu0 }
 0x1be   :  { %v356_v29 = vmul.f32 %v352_v24, %v352_v24  ;;  %v354_v25 = vpop.f32.mrb[1].mxu0  ;;  %v464_v36 = vadd.f32 0.9800666, %v352_v24  ;;  %v367_v39 = vmul.f32 0.9800666, %v352_v24 }
 0x1bf   :  { %v465_v44 = vadd.f32 -0.039733864, %v352_v24 }
 0x1c0   :  { %v357_v30 = vsub.f32 1.0, %v356_v29  ;;  %vm371_vm6 = vcmp.gt.f32.partialorder %v464_v36, 0.0 }
 0x1c2   :  { %v358_v31 = vmax.f32 %v357_v30, 0.0 }
 0x1c4   :  { %v359_v32 = vmin.f32 %v358_v31, 1.0 }
 0x1c6   :  { %546 = vrsqrt.f32 %v359_v32  ;;  %vm362_vm3 = vcmp.eq.f32.partialorder %v359_v32, inf  ;;  %v365_v33 = vand.u32 2147483648, %v359_v32  ;;  %vm364_vm4 = vcmp.eq.f32.partialorder %v359_v32, 0.0 }
 0x1d0   :  { %v547_v35 = vpop.eup %546 }
 0x1d1   :  { %v361_v19 = vmul.f32 %v547_v35, %v359_v32 }
 0x1d3   :  { %v363_v17 = vsel %vm362_vm3, %v359_v32, %v361_v19 }
 0x1d4   :  { %v366_v12 = vsel %vm364_vm4, %v365_v33, %v363_v17 }
 0x1d5   :  { %v368_v43 = vmul.f32 0.19866933, %v366_v12 }
 0x1d7   :  { %v369_v45 = vsub.f32 %v367_v39, %v368_v43 }
 0x1d9   :  { %v373_v46 = vsel %vm371_vm6, %v369_v45, %v465_v44 }
 0x1da   :  { %v384_v48 = vsel %vm383_vm5, %v373_v46, %v352_v24 }
 0x1db   :  { %v385_v18 = vmul.f32 30.0, %v384_v48 }
 0x1dd   :  { %386 = vst [vmem:[#allocation6] sm:$0xff] %v385_v18  ;;  %v388_v23 = vsel %vm387_vm7, %v385_v18, -inf  ;;  %v413_v51 = vsel %vm383_vm5, %v385_v18, 0.0 }
 0x1de   :  { %390 = vmax.xlane.f32.xlu0 %v388_v23 }
 0x26b   :  { %v391_v28 = vpop.xlane.xlu0 %390 }
 0x26c   :  { %v392_v55 = vmax.f32 %v389_v27, %v391_v28 }
 0x26e   :  { %v393_v56 = vsub.f32 %v389_v27, %v392_v55  ;;  %411 = vst.msk [vmem:[#allocation3] sm:$0xff] %vm36_vm2, %v392_v55  ;;  %400 = vperm.xlu0 %511, %v392_v55  }
 0x28d   :  { %414 = vadd.xlane.f32.xlu0 %v413_v51 }
 0x2ed   :  { %v401_v57 = vpop.permute.xlu0 %400 }
 0x2ee   :  { %v403_v60 = vsub.f32 %v388_v23, %v401_v57 }
 0x2f0   :  { %v404_v1 = vmul.f32 1.442695, %v403_v60 }
 0x2f2   :  { %548 = vpow2.f32 %v404_v1 }
 0x2fc   :  { %v549_v61 = vpop.eup %548 }
 0x2fd   :  { %406 = vadd.xlane.f32.xlu1 %v549_v61 }
 0x31a   :  { %v415_v34 = vpop.xlane.xlu0 %414 }
 0x31b   :  { %v416_v38 = vadd.f32 %v415_v34, %v412_v5 }
 0x31d   :  { %417 = vst.msk [vmem:[#allocation5] sm:$0xff] %vm36_vm2, %v416_v38 }
 0x31e   :  { %565 = shalt.err (!%p562_p4)
}
 0x31f   :  { %s566_s9 = scalar_lea.hbm %s948_s3, 128 }
 0x320   :  { %p567_p5 = scmp.ne.s32.totalorder %s948_s3, %s566_s9  ;;  %p570_p6 = scmp.lt.u32.totalorder %s566_s9, %s948_s3 }
 0x322   :  { %p572_p7 = pnand %p570_p6, %p567_p5 }
 0x324   :  { %575 = shalt.err (!%p572_p7)
}
 0x325   :  { %438 = dma.vmem_to_hbm [thread:$0]  %s436_s5, 128, %s948_s3, [#allocation7]   ;;  %v394_v63 = vmul.f32 1.442695, %v393_v56  ;;  %v396_v6 = vld [vmem:[#allocation4] sm:$0xff]  ;;  %v421_v47 = vld [vmem:[#allocation3] sm:$0xff] }
 0x326   :  { %v426_v7 = vld [vmem:[#allocation5] sm:$0xff] }
 0x327   :  { %550 = vpow2.f32 %v394_v63 }
 0x331   :  { %v551_v40 = vpop.eup %550 }
 0x332   :  { %v397_v41 = vmul.f32 %v551_v40, %v396_v6 }
 0x38a   :  { %v407_v8 = vpop.xlane.xlu1 %406 }
 0x38b   :  { %v408_v9 = vadd.f32 %v407_v8, %v397_v41 }
 0x38d   :  { %410 = vst.msk [vmem:[#allocation4] sm:$0xff] %vm36_vm2, %v408_v9 }
 0x394   :  { %v422_v49 = vld [vmem:[#allocation4] sm:$0xff] }
 0x395   :  { %552 = vlog2.f32 %v422_v49 }
 0x39f   :  { %v553_v42 = vpop.eup %552 }
 0x3a0   :  { %v424_v0 = vmul.f32 0.6931472, %v553_v42 }
 0x3a2   :  { %v425_v50 = vadd.f32 %v424_v0, %v421_v47 }
 0x3a4   :  { %v427_v10 = vsub.f32 %v425_v50, %v426_v7 }
 0x3a6   :  { %428 = vst.msk [vmem:[%s949_s4] sm:$0xff] %vm36_vm2, %v427_v10 }
 0x3a7   :  { %576 = dma.done.wait [#allocation7], 128  }
 0x3a8   :  { %577 = vsyncadd [#allocation7], 4294967168 }
 0x3a9   :  { %446 = vsyncpa [#allocation7], 1 }

</bundles_post_ra>
